<compile_context>
chip_gen: v7x
topology: tpu7x:2x2x1
jax: 0.10.0
libtpu: 0.0.40
codegen_flags: <defaults>
</compile_context>

<pallas_src>
import functools

import jax
import jax.numpy as jnp
from jax.experimental import pallas as pl
from jax.experimental.pallas import tpu as pltpu


def _dice_sums_kernel(score_ref, tgt_ref, out_ref, acc_ref, *,
                      n_valid, tn, apply_softmax, needs_mask):
    """Accumulate per-class [intersect, z_sum, y_sum] into acc_ref (3, C);
    write out_ref once on the last pixel tile of the current batch slice."""
    k = pl.program_id(1)
    nk = pl.num_programs(1)

    @pl.when(k == 0)
    def _():
        acc_ref[...] = jnp.zeros_like(acc_ref)

    def accumulate(masked):
        s = score_ref[...].astype(jnp.float32)          # (C, tn)
        t = tgt_ref[...].astype(jnp.int32)              # (1, tn) labels

        if masked:
            # (1, tn) row predicate for the partial final tile only.
            col = jax.lax.broadcasted_iota(jnp.int32, (1, tn), 1) + k * tn
            valid = col < n_valid

        if apply_softmax:
            # softmax over the class axis (PyTorch dim=1).
            s = s - jnp.max(s, axis=0, keepdims=True)
            e = jnp.exp(s)                               # EUP slot
            s = e * (1.0 / jnp.sum(e, axis=0, keepdims=True))

        if masked:
            s = jnp.where(valid, s, 0.0)

        # One-hot: onehot[c, n] = 1 if target[n] == c.
        cls = jax.lax.broadcasted_iota(jnp.int32, (s.shape[0], tn), 0)
        hit = t == cls                                   # (C, tn) bool
        if masked:
            hit = jnp.logical_and(valid, hit)
        onehot = hit.astype(jnp.float32)

        intersect = jnp.sum(s * onehot, axis=1)          # (C,)
        z_sum = jnp.sum(s * s, axis=1)                   # (C,)
        y_sum = jnp.sum(onehot, axis=1)                  # onehot^2 == onehot
        acc_ref[...] += jnp.stack([intersect, z_sum, y_sum], axis=0)

    if needs_mask:
        # Only the last (partial) tile pays for the masking work.
        @pl.when(k == nk - 1)
        def _():
            accumulate(masked=True)

        @pl.when(k < nk - 1)
        def _():
            accumulate(masked=False)
    else:
        accumulate(masked=False)

    @pl.when(k == nk - 1)
    def _():
        out_ref[...] = acc_ref[...]


def _choose_tile(n_classes, hw, max_tn):
    """Pick the pixel-tile width: as large as possible (multiple of 128),
    bounded so ~8 live f32 copies of a (C, tn) tile stay under ~8 MiB."""
    budget = 8 * 1024 * 1024
    cap = budget // (max(n_classes, 1) * 4 * 8)
    cap = max(128, (cap // 128) * 128)
    tn = min(max_tn, cap)
    if hw <= tn:
        # A single full-width tile per batch slice is always a legal block
        # (block dim == full array dim), and needs no masking.
        return hw, False
    return tn, (hw % tn) != 0


def dice_loss(inputs, target, n_classes, weight=None, softmax=False,
              max_tn=4096):
    """Pallas implementation of DiceLoss.forward.

    inputs: (B, C, H, W) logits/probs (f32 or bf16), target: (B, H, W) ints.
    """
    # TODO(synk): the `index` argument of the PyTorch forward is unused in
    # _dice_loss (and class_wise_dice uses .item() host-side), so neither is
    # reproduced here.
    B, C, H, W = inputs.shape
    assert C == n_classes
    HW = H * W

    # Free, contiguous reshapes — no transpose, no pad, no dtype copy.
    score = inputs.reshape(B, C, HW)
    tgt = target.reshape(B, 1, HW)
    if not jnp.issubdtype(tgt.dtype, jnp.integer):
        tgt = tgt.astype(jnp.int32)

    tn, needs_mask = _choose_tile(C, HW, max_tn)
    nk = pl.cdiv(HW, tn)

    kernel = functools.partial(
        _dice_sums_kernel, n_valid=HW, tn=tn,
        apply_softmax=softmax, needs_mask=needs_mask)

    partials = pl.pallas_call(
        kernel,
        out_shape=jax.ShapeDtypeStruct((B, 3, C), jnp.float32),
        grid_spec=pltpu.PrefetchScalarGridSpec(
            num_scalar_prefetch=0,
            grid=(B, nk),
            in_specs=[
                pl.BlockSpec((None, C, tn), lambda b, k: (b, 0, k)),
                pl.BlockSpec((None, 1, tn), lambda b, k: (b, 0, k)),
            ],
            out_specs=pl.BlockSpec((None, 3, C), lambda b, k: (b, 0, 0)),
            scratch_shapes=[pltpu.VMEM((3, C), jnp.float32)],
        ),
        compiler_params=pltpu.CompilerParams(
            dimension_semantics=("parallel", "arbitrary"),
            vmem_limit_bytes=32 * 1024 * 1024,
        ),
    )(score, tgt)

    sums = jnp.sum(partials, axis=0)                      # (3, C)
    smooth = 1e-05
    intersect, z_sum, y_sum = sums[0], sums[1], sums[2]   # each (C,)
    dice = 1.0 - (2.0 * intersect + smooth) / (z_sum + y_sum + smooth)

    if weight is None:
        w = jnp.ones((C,), jnp.float32)
    else:
        w = jnp.asarray(weight, jnp.float32)
    return jnp.sum(dice * w) / n_classes


def _reference_dice_loss(inputs, target, n_classes, weight=None, softmax=False):
    """Pure-JAX replica of the PyTorch forward, for a sanity check."""
    if softmax:
        inputs = jax.nn.softmax(inputs, axis=1)
    onehot = (target[:, None, :, :] == jnp.arange(n_classes)[None, :, None, None]
              ).astype(jnp.float32)
    smooth = 1e-05
    if weight is None:
        weight = [1.0] * n_classes
    loss = 0.0
    for i in range(n_classes):
        s = inputs[:, i]
        t = onehot[:, i]
        intersect = jnp.sum(s * t)
        y_sum = jnp.sum(t * t)
        z_sum = jnp.sum(s * s)
        d = 1.0 - (2.0 * intersect + smooth) / (z_sum + y_sum + smooth)
        loss = loss + d * weight[i]
    return loss / n_classes


if __name__ == "__main__":
    key = jax.random.PRNGKey(0)

    # Case 1: small NCHW shapes, both softmax paths (single full tile per b).
    B, C, H, W = 2, 4, 16, 16
    k1, k2, k3, k4 = jax.random.split(key, 4)
    inputs = jax.random.normal(k1, (B, C, H, W), dtype=jnp.float32)
    target = jax.random.randint(k2, (B, H, W), 0, C, dtype=jnp.int32)

    out = jax.block_until_ready(dice_loss(inputs, target, C, softmax=True))
    ref = _reference_dice_loss(inputs, target, C, softmax=True)
    assert jnp.allclose(out, ref, rtol=1e-5, atol=1e-5), (out, ref)

    out2 = jax.block_until_ready(dice_loss(inputs, target, C, softmax=False))
    ref2 = _reference_dice_loss(inputs, target, C, softmax=False)
    assert jnp.allclose(out2, ref2, rtol=1e-5, atol=1e-5), (out2, ref2)

    # Case 2: force small tiles so the multi-tile + masked final-tile path
    # (H*W not a multiple of tn) is exercised as well.
    B2, C2, H2, W2 = 2, 3, 20, 20
    inputs2 = jax.random.normal(k3, (B2, C2, H2, W2), dtype=jnp.float32)
    target2 = jax.random.randint(k4, (B2, H2, W2), 0, C2, dtype=jnp.int32)

    out3 = jax.block_until_ready(
        dice_loss(inputs2, target2, C2, softmax=True, max_tn=128))
    ref3 = _reference_dice_loss(inputs2, target2, C2, softmax=True)
    assert jnp.allclose(out3, ref3, rtol=1e-5, atol=1e-5), (out3, ref3)

    print("KERNEL_OK")
</pallas_src>

<mosaic_0001>
module attributes {stable_mosaic.version = 11 : i64} {
  func.func @_dice_sums_kernel(%arg0: i32, %arg1: i32, %arg2: memref<1x4x256xf32, #tpu.memory_space<vmem>>, %arg3: memref<1x1x256xi32, #tpu.memory_space<vmem>>, %arg4: memref<1x3x4xf32, #tpu.memory_space<vmem>>, %arg5: memref<3x4xf32, #tpu.memory_space<vmem>>) attributes {dimension_semantics = [#tpu.dimension_semantics<parallel>, #tpu.dimension_semantics<arbitrary>], iteration_bounds = array<i64: 2, 1>, scalar_prefetch = 0 : i64, scratch_operands = 1 : i64, tpu.core_type = #tpu.core_type<tc>, window_params = [{transform_indices = @transform_0, window_bounds = array<i64: 1, 4, 256>}, {transform_indices = @transform_1, window_bounds = array<i64: 1, 1, 256>}, {transform_indices = @transform_2, window_bounds = array<i64: 1, 3, 4>}]} {
    %c0_i32 = arith.constant 0 : i32
    %0 = arith.cmpi eq, %arg1, %c0_i32 : i32
    %1 = arith.extui %0 : i1 to i32
    %c0_i32_0 = arith.constant 0 : i32
    %2 = arith.cmpi ne, %1, %c0_i32_0 : i32
    scf.if %2 {
      %cst_17 = arith.constant 0.000000e+00 : f32
      %38 = vector.broadcast %cst_17 : f32 to vector<3x4xf32>
      %c0_18 = arith.constant 0 : index
      %c0_19 = arith.constant 0 : index
      %39 = vector.load %arg5[%c0_18, %c0_19] : memref<3x4xf32, #tpu.memory_space<vmem>>, vector<3x4xf32>
      tpu.vector_store %arg5[%c0_18, %c0_19], %38 {strides = array<i32>} : memref<3x4xf32, #tpu.memory_space<vmem>>, vector<3x4xf32>,
    } else {
    }
    %c0 = arith.constant 0 : index
    %c0_1 = arith.constant 0 : index
    %c0_2 = arith.constant 0 : index
    %3 = vector.load %arg2[%c0, %c0_1, %c0_2] : memref<1x4x256xf32, #tpu.memory_space<vmem>>, vector<1x4x256xf32>
    %4 = vector.shape_cast %3 : vector<1x4x256xf32> to vector<4x256xf32>
    %c0_3 = arith.constant 0 : index
    %c0_4 = arith.constant 0 : index
    %c0_5 = arith.constant 0 : index
    %5 = vector.load %arg3[%c0_3, %c0_4, %c0_5] : memref<1x1x256xi32, #tpu.memory_space<vmem>>, vector<1x1x256xi32>
    %6 = vector.shape_cast %5 : vector<1x1x256xi32> to vector<1x256xi32>
    %cst = arith.constant dense<0xFF800000> : vector<256xf32>
    %7 = vector.multi_reduction <maximumf>, %4, %cst [0] : vector<4x256xf32> to vector<256xf32>
    %8 = vector.shape_cast %7 : vector<256xf32> to vector<1x256xf32>
    %9 = vector.broadcast %8 : vector<1x256xf32> to vector<4x256xf32>
    %10 = arith.subf %4, %9 : vector<4x256xf32>
    %11 = math.exp %10 : vector<4x256xf32>
    %cst_6 = arith.constant dense<0.000000e+00> : vector<256xf32>
    %12 = vector.multi_reduction <add>, %11, %cst_6 [0] : vector<4x256xf32> to vector<256xf32>
    %13 = vector.shape_cast %12 : vector<256xf32> to vector<1x256xf32>
    %cst_7 = arith.constant 1.000000e+00 : f32
    %14 = vector.broadcast %cst_7 : f32 to vector<1x256xf32>
    %15 = arith.divf %14, %13 : vector<1x256xf32>
    %16 = vector.broadcast %15 : vector<1x256xf32> to vector<4x256xf32>
    %17 = arith.mulf %11, %16 : vector<4x256xf32>
    %18 = tpu.iota {dimensions = array<i32: 0>} : vector<4x256xi32>
    %19 = vector.broadcast %6 : vector<1x256xi32> to vector<4x256xi32>
    %20 = arith.cmpi eq, %19, %18 : vector<4x256xi32>
    %21 = arith.extui %20 : vector<4x256xi1> to vector<4x256xi32>
    %22 = arith.sitofp %21 : vector<4x256xi32> to vector<4x256xf32>
    %23 = arith.mulf %17, %22 : vector<4x256xf32>
    %cst_8 = arith.constant dense<0.000000e+00> : vector<4xf32>
    %24 = vector.multi_reduction <add>, %23, %cst_8 [1] : vector<4x256xf32> to vector<4xf32>
    %25 = arith.mulf %17, %17 : vector<4x256xf32>
    %cst_9 = arith.constant dense<0.000000e+00> : vector<4xf32>
    %26 = vector.multi_reduction <add>, %25, %cst_9 [1] : vector<4x256xf32> to vector<4xf32>
    %cst_10 = arith.constant dense<0.000000e+00> : vector<4xf32>
    %27 = vector.multi_reduction <add>, %22, %cst_10 [1] : vector<4x256xf32> to vector<4xf32>
    %c0_11 = arith.constant 0 : index
    %c0_12 = arith.constant 0 : index
    %28 = vector.load %arg5[%c0_11, %c0_12] : memref<3x4xf32, #tpu.memory_space<vmem>>, vector<3x4xf32>
    %29 = vector.shape_cast %24 : vector<4xf32> to vector<1x4xf32>
    %30 = vector.shape_cast %26 : vector<4xf32> to vector<1x4xf32>
    %31 = vector.shape_cast %27 : vector<4xf32> to vector<1x4xf32>
    %32 = tpu.concatenate %29, %30, %31 in 0 : vector<1x4xf32>, vector<1x4xf32>, vector<1x4xf32> -> vector<3x4xf32>
    %33 = arith.addf %28, %32 : vector<3x4xf32>
    %c0_13 = arith.constant 0 : index
    %c0_14 = arith.constant 0 : index
    %34 = vector.load %arg5[%c0_13, %c0_14] : memref<3x4xf32, #tpu.memory_space<vmem>>, vector<3x4xf32>
    tpu.vector_store %arg5[%c0_13, %c0_14], %33 {strides = array<i32>} : memref<3x4xf32, #tpu.memory_space<vmem>>, vector<3x4xf32>,
    %c0_i32_15 = arith.constant 0 : i32
    %35 = arith.cmpi eq, %arg1, %c0_i32_15 : i32
    %36 = arith.extui %35 : i1 to i32
    %c0_i32_16 = arith.constant 0 : i32
    %37 = arith.cmpi ne, %36, %c0_i32_16 : i32
    scf.if %37 {
      %c0_17 = arith.constant 0 : index
      %c0_18 = arith.constant 0 : index
      %38 = vector.load %arg5[%c0_17, %c0_18] : memref<3x4xf32, #tpu.memory_space<vmem>>, vector<3x4xf32>
      %c0_19 = arith.constant 0 : index
      %c0_20 = arith.constant 0 : index
      %c0_21 = arith.constant 0 : index
      %39 = vector.load %arg4[%c0_19, %c0_20, %c0_21] : memref<1x3x4xf32, #tpu.memory_space<vmem>>, vector<1x3x4xf32>
      %40 = vector.shape_cast %39 : vector<1x3x4xf32> to vector<3x4xf32>
      %41 = vector.shape_cast %38 : vector<3x4xf32> to vector<1x3x4xf32>
      tpu.vector_store %arg4[%c0_19, %c0_20, %c0_21], %41 {strides = array<i32>} : memref<1x3x4xf32, #tpu.memory_space<vmem>>, vector<1x3x4xf32>,
    } else {
    }
    return
  }
  func.func @transform_0(%arg0: i32, %arg1: i32) -> (i32, i32, i32) {
    %c0_i32 = arith.constant 0 : i32
    %c0_i32_0 = arith.constant 0 : i32
    return %arg0, %c0_i32, %arg1 : i32, i32, i32
  }
  func.func @transform_1(%arg0: i32, %arg1: i32) -> (i32, i32, i32) {
    %c0_i32 = arith.constant 0 : i32
    %c0_i32_0 = arith.constant 0 : i32
    return %arg0, %c0_i32, %arg1 : i32, i32, i32
  }
  func.func @transform_2(%arg0: i32, %arg1: i32) -> (i32, i32, i32) {
    %c0_i32 = arith.constant 0 : i32
    %c0_i32_0 = arith.constant 0 : i32
    %c0_i32_1 = arith.constant 0 : i32
    return %arg0, %c0_i32, %c0_i32_0 : i32, i32, i32
  }
}

</mosaic_0001>

<bundles_post_ra>
// kernel: tpu_custom_call.1
= control target key start
LH: loop header
LB: loop body
LE: loop exit
PB: predicated region body
PF: predicated region fallthrough
CT: control target
= control target key end

     0   :  { %7 = vsyncpa [#allocation4], 0  ;;  %s863_s0 = inlined_call_operand.hbm [shape: f32[2,4,256], index: 0, kind: input, shape index: {}]   ;;  %s864_s1 = inlined_call_operand.hbm [shape: s32[2,1,256], index: 1, kind: input, shape index: {}]   ;;  %s865_s2 = inlined_call_operand.vmem [shape: f32[2,3,4], index: 2, kind: output, shape index: {}]  }
   0x1   :  { %9 = vsyncpa [#allocation4 + $0x1], 0 }
   0x2   :  { %10 = vsyncpa [#allocation6], 0 }
   0x3   :  { %12 = vsyncpa [#allocation6 + $0x1], 0  ;;  %s679_s9 = smov 0   ;;  %s681_s10 = smov 0  }
   0x4   :  { %s683_s11 = smov 0   ;;  %s685_s12 = smov 0  }
   0x5   :  { %s687_s13 = smov 0   ;;  %s689_s14 = smov 0  }
   0x6 LB: > { %s457_s15 = sadd.s32 4294967295, %s659_s14   ;;  %s30_s16 = sadd.s32 1, %s655_s13  ;;  %s659_s14 = sphi %s689_s14, %s18_s14   ;;  %s655_s13 = sphi %s687_s13, %s879_s13   ;;  %s651_s12 = sphi %s685_s12, %s878_s12   ;;  %s647_s11 = sphi %s683_s11, %s877_s11   ;;  %s643_s10 = sphi %s681_s10, %s876_s10   ;;  %s639_s9 = sphi %s679_s9, %s875_s9  }
   0x7   : > { %p32_p0 = scmp.ge.s32.totalorder %s30_s16, 2  ;;  %s39_s17 = sadd.s32 1, %s647_s11 }
   0x8   : > { %p46_p1 = scmp.ne.s32.totalorder %s647_s11, %s643_s10  ;;  %p47_p2 = scmp.eq.s32.totalorder %s659_s14, 0 }
   0x9   : > { %s881_s16 = smov (%p32_p0, %s30_s16), 0  ;;  %p52_p4 = scmp.ne.s32.totalorder %s643_s10, %s639_s9 }
   0xa   : > { %p715_p3 = por %p47_p2, %p46_p1  ;;  %s34_s19 = ssub.s32 %s655_s13, %s881_s16 }
   0xb   : > { %p53_p5 = scmp.eq.s32.totalorder %s457_s15, 0  ;;  %p37_p6 = scmp.eq.s32.totalorder %s34_s19, 0 }
   0xc   : > { %p488_p8 = scmp.lt.s32.totalorder %s659_s14, 2  ;;  %s731_s22 = sand.u32 1, %s647_s11  }
   0xd   : > { %p722_p7 = por %p53_p5, %p52_p4  ;;  %s475_s23 = sshll.u32 %s655_s13, 7 }
   0xe   : > { %s728_s21 = scalar_select %p37_p6, %s647_s11, %s39_s17  }
   0xf   : > { %s868_s20 = scalar_select %p722_p7, 1, 0 }
  0x10   : > { %s461_s24 = sshll.u32 %s731_s22, 3  ;;  %s738_s27 = scalar_lea.hbm %s863_s0, %s475_s23 }
  0x11   : > { %s134_s28 = scalar_lea.vmem [#allocation3], %s461_s24  ;;  %p742_p9 = pnand %p488_p8, %p715_p3 }
  0x12   : > { %s144_s29 = sshll.u32 %s134_s28, 4  ;;  %s131_s3 = scalar_lea.sflag [#allocation4], %s731_s22  ;;  %s746_s29 = int_to_ptr.vmem [resolvable:$true] %s144_s29 }
  0x13   : > { %s545_s4 = scalar_lea.hbm %s738_s27, 128  ;;  %p547_p13 = pneg %p742_p9 }
  0x14   : > { %p546_p12 = scmp.ne.s32.totalorder %s738_s27, %s545_s4  ;;  %s550_s7 = scalar_lea.hbm %s863_s0, 256 }
  0x15   : > { %p551_p2 = scmp.lt.u32.totalorder %s738_s27, %s863_s0  ;;  %p552_p3 = scmp.lt.u32.totalorder %s550_s7, %s545_s4 }
  0x16   : > { %p548_p0 = pnand %p547_p13, %p546_p12  ;;  %p554_p5 = scmp.lt.u32.totalorder %s545_s4, %s738_s27 }
  0x17   : > { %p553_p4 = por %p552_p3, %p551_p2 }
  0x18   : > { %p549_p1 = pneg %p548_p0 }
  0x19   : > { %p555_p6 = por %p554_p5, %p553_p4 }
  0x1b   : > { %p556_p8 = pnand %p555_p6, %p549_p1 }
  0x1d   : > { %559 = shalt.err (!%p556_p8)
}
  0x1e   : > { %s560_s15 = scalar_lea.vmem %s746_s29, 128  ;;  %s661_s17 = smov [#allocation3]  }
  0x1f   : > { %p561_p12 = scmp.ne.s32.totalorder %s746_s29, %s560_s15  ;;  %s565_s18 = sshll.u32 %s661_s17, 4  ;;  %s566_s18 = int_to_ptr.vmem [resolvable:$false] %s565_s18 }
  0x20   : > { %s567_s19 = scalar_lea.vmem %s566_s18, 256  ;;  %p568_p11 = scmp.lt.s32.totalorder %s746_s29, %s566_s18 }
  0x21   : > { %p563_p0 = pnand %p561_p12, %p547_p13  ;;  %p569_p2 = scmp.lt.s32.totalorder %s567_s19, %s560_s15 }
  0x23   : > { %p564_p10 = pneg %p563_p0  ;;  %p570_p3 = por %p569_p2, %p568_p11 }
  0x25   : > { %p571_p4 = pnand %p570_p3, %p564_p10 }
  0x27   : > { %574 = shalt.err (!%p571_p4)
}
  0x28   : > { %484 = dma.hbm_to_vmem [thread:$0]  (!%p742_p9), %s738_s27, 128, %s746_s29, %s131_s3  }
  0x29   : > { %p870_p1 = scmp.lt.s32.totalorder %s659_s14, 3  ;;  %p871_p5 = scmp.ge.s32.totalorder %s659_s14, 1 }
  0x2a   : > { %s464_s24 = sshll.u32 %s731_s22, 1  ;;  %s476_s25 = sshll.u32 %s655_s13, 5 }
  0x2b   : > { %p780_p6 = pnand %p871_p5, %p870_p1  ;;  %s789_s4 = scalar_lea.hbm %s864_s1, %s476_s25 }
  0x2c   : > { %s155_s5 = scalar_lea.vmem [#allocation5], %s464_s24  ;;  %s152_s27 = scalar_lea.sflag [#allocation6], %s731_s22 }
  0x2d   : > { %s872_s23 = scalar_select %p780_p6, 1, 0 }
  0x2e   : > { %s165_s6 = sshll.u32 %s155_s5, 4  ;;  %s575_s29 = scalar_lea.hbm %s789_s4, 32  ;;  %s166_s6 = int_to_ptr.vmem [resolvable:$true] %s165_s6 }
  0x2f   : > { %p576_p10 = scmp.ne.s32.totalorder %s789_s4, %s575_s29  ;;  %s580_s8 = scalar_lea.hbm %s864_s1, 64 }
  0x30   : > { %p581_p12 = scmp.lt.u32.totalorder %s789_s4, %s864_s1  ;;  %p582_p0 = scmp.lt.u32.totalorder %s580_s8, %s575_s29 }
  0x31   : > { %p578_p11 = pnand %p576_p10, %p547_p13  ;;  %p584_p3 = scmp.lt.u32.totalorder %s575_s29, %s789_s4 }
  0x32   : > { %p583_p2 = por %p582_p0, %p581_p12 }
  0x33   : > { %p579_p8 = pneg %p578_p11 }
  0x34   : > { %p585_p4 = por %p584_p3, %p583_p2 }
  0x36   : > { %p586_p1 = pnand %p585_p4, %p579_p8 }
  0x38   : > { %589 = shalt.err (!%p586_p1)
}
  0x39   : > { %s590_s22 = scalar_lea.vmem %s166_s6, 32  ;;  %s662_s17 = smov [#allocation5]  }
  0x3a   : > { %p591_p5 = scmp.ne.s32.totalorder %s166_s6, %s590_s22  ;;  %s595_s18 = sshll.u32 %s662_s17, 4  ;;  %s596_s18 = int_to_ptr.vmem [resolvable:$false] %s595_s18 }
  0x3b   : > { %s597_s19 = scalar_lea.vmem %s596_s18, 64  ;;  %p598_p7 = scmp.lt.s32.totalorder %s166_s6, %s596_s18 }
  0x3c   : > { %p593_p10 = pnand %p591_p5, %p547_p13  ;;  %p599_p6 = scmp.lt.s32.totalorder %s597_s19, %s590_s22 }
  0x3e   : > { %p594_p11 = pneg %p593_p10  ;;  %p600_p0 = por %p599_p6, %p598_p7 }
  0x40   : > { %p601_p12 = pnand %p600_p0, %p594_p11 }
  0x42   : > { %604 = shalt.err (!%p601_p12)
}
  0x43   : > { %487 = dma.hbm_to_vmem [thread:$0]  (!%p742_p9), %s789_s4, 32, %s166_s6, %s152_s27  }
  0x44   : > { %p873_p8 = scmp.ne.s32.totalorder %s872_s23, 0 }
  0x45   : > { %s176_s24 = sand.u32 (!%p873_p8), 1, %s643_s10   ;;  %p874_p13 = scmp.ne.s32.totalorder (!%p873_p8), %s868_s20, 0 }
  0x46   : > { %174 = sbr.rel (%p873_p8) target bundleno = 313 (0x139), region = 28  ;;  %s468_s25 = sshll.u32 (!%p873_p8), %s176_s24, 3 }
  0x47   : > { %s177_s26 = scalar_lea.sflag (!%p873_p8), [#allocation4], %s176_s24  ;;  %s180_s28 = scalar_lea.vmem (!%p873_p8), [#allocation3], %s468_s25 }
  0x4d   : > { %630 = dma.done.wait (%p874_p13), %s177_s26, 128  }
  0x4e   : > { %632 = vsyncadd (%p874_p13), %s177_s26, 4294967168  ;;  %s469_s5 = sshll.u32 %s176_s24, 1  ;;  %s186_s29 = scalar_lea.sflag [#allocation6], %s176_s24 }
  0x4f   : > { %s189_s30 = scalar_lea.vmem [#allocation5], %s469_s5 }
  0x50   : > { %634 = dma.done.wait (%p874_p13), %s186_s29, 32  }
  0x51   : > { %636 = vsyncadd (%p874_p13), %s186_s29, 4294967264  ;;  %vm224_vm0 = vcmask 26624   ;;  %v279_v0 = vlaneseq  ;;  %v663_v1 = vmov 0.0   ;;  %vm231_vm1 = vcmask 1043456   ;;  %v226_v7 = vld [vmem:[%s180_s28] sm:$0xff]  ;;  %p216_p7 = scmp.lt.s32.totalorder %s651_s12, 1 }
  0x52   : > { %225 = vst.msk [vmem:[#allocation2] sm:$0x7] %vm224_vm0, %v663_v1  ;;  %v227_v8 = vld [vmem:[%s189_s30] sm:$0x3]  ;;  %v229_v9 = vcombine.high %v226_v7, %v226_v7  ;;  %v232_v10 = vsel %vm231_vm1, %v226_v7, -inf  ;;  %vm343_vm4 = vcmask 1040384  }
  0x53   : > { %v280_v2 = vshrl.u32 %v279_v0, 7  ;;  %v325_v3 = vand.u32 127, %v279_v0  ;;  %v233_v13 = vrot.slane %v232_v10, 4  ;;  %vm345_vm5 = vcmask 1041408   ;;  %s883_s12 = smov (!%p216_p7, %s651_s12), 1 }
  0x54   : > { %v239_v14 = vsel %vm231_vm1, %v229_v9, -inf  ;;  %s470_s20 = sshll.u32 %s883_s12, 2 }
  0x55   : > { %v283_v4 = vsub.s32 0, %v280_v2  ;;  %v287_v5 = vsub.s32 1, %v280_v2  ;;  %v823_v6 = vsub.s32 %v325_v3, %v280_v2  ;;  %v234_v15 = vmax.f32 %v232_v10, %v233_v13  ;;  %s219_s6 = scalar_lea.vmem %s865_s2, %s470_s20 }
  0x56   : > { %v240_v16 = vrot.slane %v239_v14, 4 }
  0x57   : > { %v284_v11 = vrot.slane %v227_v8, %v283_v4  ;;  %v288_v12 = vrot.slane %v227_v8, %v287_v5  ;;  %v235_v21 = vrot.slane %v234_v15, 2 }
  0x58   : > { %v241_v22 = vmax.f32 %v239_v14, %v240_v16 }
  0x59   : > { %vm289_vm2 = vcmp.eq.s32.totalorder %v284_v11, %v280_v2  ;;  %vm290_vm3 = vcmp.eq.s32.totalorder %v288_v12, %v280_v2  ;;  %v236_v24 = vmax.f32 %v234_v15, %v235_v21  ;;  %v322_v8 = vld [vmem:[#allocation2] sm:$0x7] }
  0x5a   : > { %v471_v17 = vsel %vm289_vm2, 1.0, %v663_v1  ;;  %v472_v18 = vsel %vm290_vm3, 1.0, %v663_v1  ;;  %v242_v25 = vrot.slane %v241_v22, 2 }
  0x5b   : > { %v317_v19 = vsel %vm231_vm1, %v471_v17, 0.0  ;;  %v318_v20 = vsel %vm231_vm1, %v472_v18, 0.0  ;;  %v237_v26 = vrot.slane %v236_v24, 1  ;;  %v297_v53 = vcombine.low %v471_v17, %v472_v18 }
  0x5c   : > { %v319_v23 = vadd.f32 %v318_v20, %v317_v19  ;;  %v243_v27 = vmax.f32 %v241_v22, %v242_v25 }
  0x5d   : > { %v238_v28 = vmax.f32 %v236_v24, %v237_v26 }
  0x5e   : > { %320 = vadd.xlane.f32.xlu1 %v319_v23  ;;  %v244_v29 = vrot.slane %v243_v27, 1 }
  0x60   : > { %v245_v30 = vmax.f32 %v243_v27, %v244_v29 }
  0x62   : > { %v248_v31 = vcombine.low %v238_v28, %v245_v30 }
  0x64   : > { %v250_v32 = vsub.f32 %v226_v7, %v248_v31 }
  0x66   : > { %v251_v33 = vmul.f32 1.442695, %v250_v32 }
  0x68   : > { %539 = vpow2.f32 %v251_v33 }
  0x72   : > { %v540_v34 = vpop.eup %539 }
  0x73   : > { %v254_v35 = vcombine.high %v540_v34, %v540_v34  ;;  %v256_v36 = vsel %vm231_vm1, %v540_v34, 0.0 }
  0x74   : > { %v257_v37 = vrot.slane %v256_v36, 4 }
  0x75   : > { %v263_v38 = vsel %vm231_vm1, %v254_v35, 0.0 }
  0x76   : > { %v258_v39 = vadd.f32 %v257_v37, %v256_v36  ;;  %v264_v40 = vrot.slane %v263_v38, 4 }
  0x78   : > { %v259_v41 = vrot.slane %v258_v39, 2  ;;  %v265_v42 = vadd.f32 %v264_v40, %v263_v38 }
  0x7a   : > { %v260_v43 = vadd.f32 %v259_v41, %v258_v39  ;;  %v266_v44 = vrot.slane %v265_v42, 2 }
  0x7c   : > { %v261_v45 = vrot.slane %v260_v43, 1  ;;  %v267_v46 = vadd.f32 %v266_v44, %v265_v42 }
  0x7e   : > { %v262_v47 = vadd.f32 %v261_v45, %v260_v43  ;;  %v268_v48 = vrot.slane %v267_v46, 1 }
  0x80   : > { %v269_v49 = vadd.f32 %v268_v48, %v267_v46  ;;  %541 = vrcp.f32 %v262_v47 }
  0x82   : > { %543 = vrcp.f32 %v269_v49 }
  0x8a   : > { %v542_v50 = vpop.eup %541 }
  0x8c   : > { %v544_v51 = vpop.eup %543 }
  0x8d   : > { %v276_v52 = vcombine.low %v542_v50, %v544_v51 }
  0x8f   : > { %v278_v54 = vmul.f32 %v540_v34, %v276_v52 }
  0x91   : > { %v299_v55 = vmul.f32 %v297_v53, %v278_v54  ;;  %v308_v56 = vmul.f32 %v278_v54, %v278_v54 }
  0x93   : > { %v301_v57 = vcombine.high %v299_v55, %v299_v55  ;;  %v303_v58 = vsel %vm231_vm1, %v299_v55, 0.0  ;;  %v310_v59 = vcombine.high %v308_v56, %v308_v56  ;;  %v312_v61 = vsel %vm231_vm1, %v308_v56, 0.0 }
  0x95   : > { %v304_v60 = vsel %vm231_vm1, %v301_v57, 0.0  ;;  %v313_v62 = vsel %vm231_vm1, %v310_v59, 0.0 }
  0x96   : > { %v305_v63 = vadd.f32 %v304_v60, %v303_v58  ;;  %v314_v0 = vadd.f32 %v313_v62, %v312_v61 }
  0x98   : > { %306 = vadd.xlane.f32.xlu0 %v305_v63 }
  0x9c   : > { %315 = vadd.xlane.f32.xlu0 %v314_v0 }
  0xeb   : > { %v321_v2 = vpop.xlane.xlu1 %320 }
  0xec   : > { %v341_v4 = vrot.slane %v321_v2, %v823_v6 }
 0x125   : > { %v307_v1 = vpop.xlane.xlu0 %306 }
 0x126   : > { %v329_v5 = vrot.slane %v307_v1, %v823_v6 }
 0x129   : > { %v316_v3 = vpop.xlane.xlu0 %315 }
 0x12a   : > { %v335_v7 = vrot.slane %v316_v3, %v823_v6 }
 0x12c   : > { %v344_v9 = vsel %vm343_vm4, %v329_v5, %v335_v7 }
 0x12d   : > { %v346_v10 = vsel %vm345_vm5, %v344_v9, %v341_v4 }
 0x12e   : > { %v347_v11 = vadd.f32 %v346_v10, %v322_v8 }
 0x130   : > { %349 = vst.msk [vmem:[#allocation2] sm:$0x7] %vm224_vm0, %v347_v11 }
 0x137   : > { %v353_v12 = vld [vmem:[#allocation2] sm:$0x7] }
 0x138   : > { %354 = vst.msk [vmem:[%s219_s6] sm:$0x7] %vm224_vm0, %v353_v12 }
 0x139 PF: > { %s18_s14 = sadd.s32 1, %s659_s14   ;;  %s875_s9 = smov %s643_s10 }
 0x13a   : > { %p15_p9 = scmp.ge.s32.totalorder %s18_s14, 4   ;;  %s876_s10 = smov %s647_s11 }
 0x13b   : > { %s877_s11 = smov %s728_s21  ;;  %s878_s12 = smov %s655_s13 }
 0x13c   : > { %s879_s13 = smov %s881_s16  ;;  %17 = sbr.rel (!%p15_p9) target bundleno = 6 (0x6), region = 89 }
 0x143   :  { %374 = vsyncpa [#allocation4], 1 }
 0x144   :  { %376 = vsyncpa [#allocation4 + $0x1], 1 }
 0x145   :  { %377 = vsyncpa [#allocation6], 1 }
 0x146   :  { %379 = vsyncpa [#allocation6 + $0x1], 1 }

</bundles_post_ra>
